<compile_context>
chip_gen: v5e
topology: v5e:2x2
jax: 0.10.0
libtpu: 0.0.40
codegen_flags: <defaults>
</compile_context>

<pallas_src>
import jax
import jax.numpy as jnp
from jax.experimental import pallas as pl
from jax.experimental.pallas import tpu as pltpu


def _attn_word_kernel(emb_ref,       # VMEM (TB, S, E)
                      lens_ref,      # VMEM (TB, 1) int32
                      wrt_ref,       # VMEM (E, E)  = word_reduce.weight.T
                      br_ref,        # VMEM (1, E)  = word_reduce.bias
                      wa_ref,        # VMEM (1, E)  = attn.weight (row)
                      ba_ref,        # VMEM (1, 1)  = attn.bias
                      applied_ref,   # VMEM (TB, E)  out: attn_applied
                      weights_ref):  # VMEM (TB, S)  out: attn_weights
    emb = emb_ref[...]                                   # (TB, S, E)
    TB, S, E = emb.shape

    # word_reduce -> tanh, batch folded into the matmul M dimension.
    emb2 = emb.reshape(TB * S, E)
    z = jnp.tanh(
        jnp.dot(emb2, wrt_ref[...], preferred_element_type=jnp.float32)
        + br_ref[...])                                   # (TB*S, E) f32

    # attn projection: scores[b, s] = sum_e z[b, s, e] * wa[e] + ba
    # computed as a lane reduction so `scores` comes out row-oriented (TB, S).
    prod = (z * wa_ref[...]).reshape(TB, S, E)
    scores = jnp.sum(prod, axis=-1) + ba_ref[...]        # (TB, S) f32

    # Length-masked softmax along the sentence (lane) axis.
    lens = lens_ref[...]                                 # (TB, 1) int32
    pos = jax.lax.broadcasted_iota(jnp.int32, (TB, S), 1)
    valid = pos < lens                                   # (TB, S)

    masked = jnp.where(valid, scores, -1e30)
    m = jnp.max(masked, axis=-1, keepdims=True)          # (TB, 1)
    e = jnp.where(valid, jnp.exp(scores - m), 0.0)       # (TB, S)
    denom = jnp.sum(e, axis=-1, keepdims=True)           # (TB, 1)
    # Guard against zero-length (padded) rows -> all-zero weights, not NaN.
    d = jnp.where(denom > 0.0, denom, 1.0)
    r = pl.reciprocal(d, approx=True)                    # EUP slot
    r = r * (2.0 - d * r)                                # one Newton step (~f32)
    w = e * r                                            # (TB, S)

    weights_ref[...] = w.astype(weights_ref.dtype)

    # attn_applied[b, :] = sum_s w[b, s] * emb[b, s, :]   (batched MXU matmul)
    applied = jnp.einsum('bqs,bse->bqe',
                         w[:, None, :].astype(emb.dtype), emb,
                         preferred_element_type=jnp.float32)   # (TB, 1, E)
    applied_ref[...] = applied[:, 0, :].astype(applied_ref.dtype)


def attn_word_forward(embedded, lengths, wr, br, wa, ba, *, block_b=None):
    """embedded: (B, S, E); lengths: (B,) int; wr: (E, E) [out, in]; br: (E,);
       wa: (1, E); ba: (1,).  Returns (attn_applied (B, E), attn_weights (B, S))."""
    B, S, E = embedded.shape

    if block_b is None:
        # ~1 MiB of `embedded` per grid step (halve / re-derive if VMEM-tight
        # on v7x's 64 MiB); multiple of 8 keeps blocked outputs sublane-aligned.
        per_row = S * E * embedded.dtype.itemsize
        block_b = max(8, min(512, ((1 << 20) // max(per_row, 1)) // 8 * 8))

    TB = min(block_b, B)
    if TB != B and TB % 8 != 0:
        TB = max(8, ((TB + 7) // 8) * 8)
    Bp = ((B + TB - 1) // TB) * TB

    if Bp != B:
        # Padded rows get length 0 -> all-zero weights (guarded in-kernel).
        embedded = jnp.pad(embedded, ((0, Bp - B), (0, 0), (0, 0)))
        lengths = jnp.pad(lengths, (0, Bp - B))

    lens_col = lengths.astype(jnp.int32).reshape(Bp, 1)
    wr_t = wr.T                       # (E, E): x @ wr_t == x @ wr.T
    br2 = br.reshape(1, E)
    wa_row = wa.reshape(1, E)
    ba2 = ba.reshape(1, 1)

    applied, weights = pl.pallas_call(
        _attn_word_kernel,
        out_shape=(
            jax.ShapeDtypeStruct((Bp, E), embedded.dtype),
            jax.ShapeDtypeStruct((Bp, S), embedded.dtype),
        ),
        grid=(Bp // TB,),
        in_specs=[
            pl.BlockSpec((TB, S, E), lambda b: (b, 0, 0)),   # embedded tile
            pl.BlockSpec((TB, 1),    lambda b: (b, 0)),      # lengths (column)
            pl.BlockSpec((E, E),     lambda b: (0, 0)),      # wr_t   (resident)
            pl.BlockSpec((1, E),     lambda b: (0, 0)),      # br
            pl.BlockSpec((1, E),     lambda b: (0, 0)),      # wa row
            pl.BlockSpec((1, 1),     lambda b: (0, 0)),      # ba
        ],
        out_specs=(
            pl.BlockSpec((TB, E), lambda b: (b, 0)),         # attn_applied
            pl.BlockSpec((TB, S), lambda b: (b, 0)),         # attn_weights
        ),
        compiler_params=pltpu.CompilerParams(
            dimension_semantics=("parallel",)),
    )(embedded, lens_col, wr_t, br2, wa_row, ba2)

    return applied[:B], weights[:B]


def _reference_forward(embedded, lengths, wr, br, wa, ba):
    B, S, E = embedded.shape
    x = embedded.reshape(-1, E)
    z = jnp.tanh(x @ wr.T + br)
    a = (z @ wa.T + ba).reshape(B, S)
    mask = jnp.arange(S)[None, :] < lengths[:, None]
    a_masked = jnp.where(mask, a, -jnp.inf)
    m = jnp.max(a_masked, axis=-1, keepdims=True)
    e = jnp.where(mask, jnp.exp(a - m), 0.0)
    w = e / jnp.sum(e, axis=-1, keepdims=True)
    applied = jnp.einsum("bse,bs->be", embedded, w)
    return applied, w.astype(embedded.dtype)


if __name__ == "__main__":
    key = jax.random.PRNGKey(0)
    B, S, H = 16, 8, 32          # batch, sent_count, hidden_size (max_length=1 -> E=H)
    E = H

    k_emb, k_wr, k_br, k_wa, k_ba, k_len = jax.random.split(key, 6)
    embedded = jax.random.normal(k_emb, (B, S, E), dtype=jnp.float32)
    # nn.Linear(E, E) and nn.Linear(E, 1) parameters, deterministic init
    wr = jax.random.normal(k_wr, (E, E), dtype=jnp.float32) * 0.1
    br = jax.random.normal(k_br, (E,), dtype=jnp.float32) * 0.1
    wa = jax.random.normal(k_wa, (1, E), dtype=jnp.float32) * 0.1
    ba = jax.random.normal(k_ba, (1,), dtype=jnp.float32) * 0.1
    lengths = jax.random.randint(k_len, (B,), 1, S + 1, dtype=jnp.int32)

    # block_b=8 -> 2 grid steps at this small demo size (exercises batch blocking).
    applied, weights = attn_word_forward(embedded, lengths, wr, br, wa, ba, block_b=8)
    jax.block_until_ready((applied, weights))

    ref_applied, ref_weights = _reference_forward(embedded, lengths, wr, br, wa, ba)
    assert jnp.allclose(applied, ref_applied, atol=1e-5, rtol=1e-5), "attn_applied mismatch"
    assert jnp.allclose(weights, ref_weights, atol=1e-5, rtol=1e-5), "attn_weights mismatch"
    print("KERNEL_OK")
</pallas_src>

<mosaic_0001>
module attributes {stable_mosaic.version = 11 : i64} {
  func.func @_attn_word_kernel(%arg0: i32, %arg1: memref<8x8x32xf32, #tpu.memory_space<vmem>>, %arg2: memref<8x1xi32, #tpu.memory_space<vmem>>, %arg3: memref<32x32xf32, #tpu.memory_space<vmem>>, %arg4: memref<1x32xf32, #tpu.memory_space<vmem>>, %arg5: memref<1x32xf32, #tpu.memory_space<vmem>>, %arg6: memref<1x1xf32, #tpu.memory_space<vmem>>, %arg7: memref<8x32xf32, #tpu.memory_space<vmem>>, %arg8: memref<8x8xf32, #tpu.memory_space<vmem>>) attributes {dimension_semantics = [#tpu.dimension_semantics<parallel>], iteration_bounds = array<i64: 2>, scalar_prefetch = 0 : i64, scratch_operands = 0 : i64, tpu.core_type = #tpu.core_type<tc>, window_params = [{transform_indices = @transform_0, window_bounds = array<i64: 8, 8, 32>}, {transform_indices = @transform_1, window_bounds = array<i64: 8, 1>}, {pipeline_mode = #tpu.pipeline_mode<synchronous>, transform_indices = @transform_2, window_bounds = array<i64: 32, 32>}, {pipeline_mode = #tpu.pipeline_mode<synchronous>, transform_indices = @transform_3, window_bounds = array<i64: 1, 32>}, {pipeline_mode = #tpu.pipeline_mode<synchronous>, transform_indices = @transform_4, window_bounds = array<i64: 1, 32>}, {pipeline_mode = #tpu.pipeline_mode<synchronous>, transform_indices = @transform_5, window_bounds = array<i64: 1, 1>}, {transform_indices = @transform_6, window_bounds = array<i64: 8, 32>}, {transform_indices = @transform_7, window_bounds = array<i64: 8, 8>}]} {
    %c0 = arith.constant 0 : index
    %c0_0 = arith.constant 0 : index
    %c0_1 = arith.constant 0 : index
    %0 = vector.load %arg1[%c0, %c0_0, %c0_1] : memref<8x8x32xf32, #tpu.memory_space<vmem>>, vector<8x8x32xf32>
    %1 = vector.shape_cast %0 : vector<8x8x32xf32> to vector<64x32xf32>
    %c0_2 = arith.constant 0 : index
    %c0_3 = arith.constant 0 : index
    %2 = vector.load %arg3[%c0_2, %c0_3] : memref<32x32xf32, #tpu.memory_space<vmem>>, vector<32x32xf32>
    %cst = arith.constant dense<0.000000e+00> : vector<64x32xf32>
    %3 = tpu.matmul %1, %2, %cst {dimension_numbers = #tpu.dot_dimension_numbers<[1], [0], [0], [1], [0, 0, 1, 1], [], []>} : vector<64x32xf32>, vector<32x32xf32>, vector<64x32xf32> -> vector<64x32xf32>
    %c0_4 = arith.constant 0 : index
    %c0_5 = arith.constant 0 : index
    %4 = vector.load %arg4[%c0_4, %c0_5] : memref<1x32xf32, #tpu.memory_space<vmem>>, vector<1x32xf32>
    %5 = vector.broadcast %4 : vector<1x32xf32> to vector<64x32xf32>
    %6 = arith.addf %3, %5 : vector<64x32xf32>
    %7 = math.tanh %6 : vector<64x32xf32>
    %c0_6 = arith.constant 0 : index
    %c0_7 = arith.constant 0 : index
    %8 = vector.load %arg5[%c0_6, %c0_7] : memref<1x32xf32, #tpu.memory_space<vmem>>, vector<1x32xf32>
    %9 = vector.broadcast %8 : vector<1x32xf32> to vector<64x32xf32>
    %10 = arith.mulf %7, %9 : vector<64x32xf32>
    %11 = vector.shape_cast %10 : vector<64x32xf32> to vector<8x8x32xf32>
    %cst_8 = arith.constant dense<0.000000e+00> : vector<8x8xf32>
    %12 = vector.multi_reduction <add>, %11, %cst_8 [2] : vector<8x8x32xf32> to vector<8x8xf32>
    %c0_9 = arith.constant 0 : index
    %c0_10 = arith.constant 0 : index
    %13 = vector.load %arg6[%c0_9, %c0_10] : memref<1x1xf32, #tpu.memory_space<vmem>>, vector<1x1xf32>
    %14 = vector.broadcast %13 : vector<1x1xf32> to vector<8x8xf32>
    %15 = arith.addf %12, %14 : vector<8x8xf32>
    %c0_11 = arith.constant 0 : index
    %c0_12 = arith.constant 0 : index
    %16 = vector.load %arg2[%c0_11, %c0_12] : memref<8x1xi32, #tpu.memory_space<vmem>>, vector<8x1xi32>
    %17 = tpu.iota {dimensions = array<i32: 1>} : vector<8x8xi32>
    %18 = vector.broadcast %16 : vector<8x1xi32> to vector<8x8xi32>
    %19 = arith.cmpi slt, %17, %18 : vector<8x8xi32>
    %cst_13 = arith.constant -1.000000e+30 : f32
    %20 = vector.broadcast %cst_13 : f32 to vector<8x8xf32>
    %21 = arith.select %19, %15, %20 : vector<8x8xi1>, vector<8x8xf32>
    %cst_14 = arith.constant dense<0xFF800000> : vector<8xf32>
    %22 = vector.multi_reduction <maximumf>, %21, %cst_14 [1] : vector<8x8xf32> to vector<8xf32>
    %23 = vector.shape_cast %22 : vector<8xf32> to vector<8x1xf32>
    %24 = vector.broadcast %23 : vector<8x1xf32> to vector<8x8xf32>
    %25 = arith.subf %15, %24 : vector<8x8xf32>
    %26 = math.exp %25 : vector<8x8xf32>
    %cst_15 = arith.constant 0.000000e+00 : f32
    %27 = vector.broadcast %cst_15 : f32 to vector<8x8xf32>
    %28 = arith.select %19, %26, %27 : vector<8x8xi1>, vector<8x8xf32>
    %cst_16 = arith.constant dense<0.000000e+00> : vector<8xf32>
    %29 = vector.multi_reduction <add>, %28, %cst_16 [1] : vector<8x8xf32> to vector<8xf32>
    %30 = vector.shape_cast %29 : vector<8xf32> to vector<8x1xf32>
    %cst_17 = arith.constant 0.000000e+00 : f32
    %31 = vector.broadcast %cst_17 : f32 to vector<8x1xf32>
    %32 = arith.cmpf ogt, %30, %31 : vector<8x1xf32>
    %cst_18 = arith.constant 1.000000e+00 : f32
    %33 = vector.broadcast %cst_18 : f32 to vector<8x1xf32>
    %34 = arith.select %32, %30, %33 : vector<8x1xi1>, vector<8x1xf32>
    %35 = tpu.reciprocal %34 {approx = true} : vector<8x1xf32> -> vector<8x1xf32>
    %36 = arith.mulf %34, %35 : vector<8x1xf32>
    %cst_19 = arith.constant 2.000000e+00 : f32
    %37 = vector.broadcast %cst_19 : f32 to vector<8x1xf32>
    %38 = arith.subf %37, %36 : vector<8x1xf32>
    %39 = arith.mulf %35, %38 : vector<8x1xf32>
    %40 = vector.broadcast %39 : vector<8x1xf32> to vector<8x8xf32>
    %41 = arith.mulf %28, %40 : vector<8x8xf32>
    %c0_20 = arith.constant 0 : index
    %c0_21 = arith.constant 0 : index
    %42 = vector.load %arg8[%c0_20, %c0_21] : memref<8x8xf32, #tpu.memory_space<vmem>>, vector<8x8xf32>
    tpu.vector_store %arg8[%c0_20, %c0_21], %41 {strides = array<i32>} : memref<8x8xf32, #tpu.memory_space<vmem>>, vector<8x8xf32>,
    %43 = vector.shape_cast %41 : vector<8x8xf32> to vector<8x1x8xf32>
    "tpu.trace_start"() <{level = 10 : i32, message = "bqs,bse->bqe"}> : () -> ()
    %cst_22 = arith.constant dense<0.000000e+00> : vector<8x1x32xf32>
    %44 = tpu.matmul %43, %0, %cst_22 {dimension_numbers = #tpu.dot_dimension_numbers<[2], [1], [1], [2], [0, 0, 0, 1, 1, 2], [0], [0]>} : vector<8x1x8xf32>, vector<8x8x32xf32>, vector<8x1x32xf32> -> vector<8x1x32xf32>
    "tpu.trace_stop"() : () -> ()
    %45 = vector.shape_cast %44 : vector<8x1x32xf32> to vector<8x32xf32>
    %c0_23 = arith.constant 0 : index
    %c0_24 = arith.constant 0 : index
    %46 = vector.load %arg7[%c0_23, %c0_24] : memref<8x32xf32, #tpu.memory_space<vmem>>, vector<8x32xf32>
    tpu.vector_store %arg7[%c0_23, %c0_24], %45 {strides = array<i32>} : memref<8x32xf32, #tpu.memory_space<vmem>>, vector<8x32xf32>,
    return
  }
  func.func @transform_0(%arg0: i32) -> (i32, i32, i32) {
    %c0_i32 = arith.constant 0 : i32
    %c0_i32_0 = arith.constant 0 : i32
    %c0_i32_1 = arith.constant 0 : i32
    return %arg0, %c0_i32, %c0_i32_0 : i32, i32, i32
  }
  func.func @transform_1(%arg0: i32) -> (i32, i32) {
    %c0_i32 = arith.constant 0 : i32
    %c0_i32_0 = arith.constant 0 : i32
    return %arg0, %c0_i32 : i32, i32
  }
  func.func @transform_2(%arg0: i32) -> (i32, i32) {
    %c0_i32 = arith.constant 0 : i32
    %c0_i32_0 = arith.constant 0 : i32
    %c0_i32_1 = arith.constant 0 : i32
    return %c0_i32, %c0_i32_0 : i32, i32
  }
  func.func @transform_3(%arg0: i32) -> (i32, i32) {
    %c0_i32 = arith.constant 0 : i32
    %c0_i32_0 = arith.constant 0 : i32
    %c0_i32_1 = arith.constant 0 : i32
    return %c0_i32, %c0_i32_0 : i32, i32
  }
  func.func @transform_4(%arg0: i32) -> (i32, i32) {
    %c0_i32 = arith.constant 0 : i32
    %c0_i32_0 = arith.constant 0 : i32
    %c0_i32_1 = arith.constant 0 : i32
    return %c0_i32, %c0_i32_0 : i32, i32
  }
  func.func @transform_5(%arg0: i32) -> (i32, i32) {
    %c0_i32 = arith.constant 0 : i32
    %c0_i32_0 = arith.constant 0 : i32
    %c0_i32_1 = arith.constant 0 : i32
    return %c0_i32, %c0_i32_0 : i32, i32
  }
  func.func @transform_6(%arg0: i32) -> (i32, i32) {
    %c0_i32 = arith.constant 0 : i32
    %c0_i32_0 = arith.constant 0 : i32
    return %arg0, %c0_i32 : i32, i32
  }
  func.func @transform_7(%arg0: i32) -> (i32, i32) {
    %c0_i32 = arith.constant 0 : i32
    %c0_i32_0 = arith.constant 0 : i32
    return %arg0, %c0_i32 : i32, i32
  }
}

</mosaic_0001>

<bundles_post_ra>
// kernel: tpu_custom_call.1
= control target key start
LH: loop header
LB: loop body
LE: loop exit
PB: predicated region body
PF: predicated region fallthrough
CT: control target
= control target key end

     0   :  { %s1569_s0 = inlined_call_operand.hbm [shape: f32[16,8,32], index: 0, kind: input, shape index: {}]   ;;  %s1570_s1 = inlined_call_operand.vmem [shape: s32[16,1], index: 1, kind: input, shape index: {}]   ;;  %s1571_s2 = inlined_call_operand.hbm [shape: f32[32,32], index: 2, kind: input, shape index: {}]   ;;  %s1572_s3 = inlined_call_operand.vmem [shape: f32[1,32], index: 3, kind: input, shape index: {}]   ;;  %s1573_s4 = inlined_call_operand.vmem [shape: f32[1,32], index: 4, kind: input, shape index: {}]   ;;  %s1574_s5 = inlined_call_operand.<no memory space> [shape: f32[1,1], index: 5, kind: input, shape index: {}]   ;;  %s1575_s6 = inlined_call_operand.hbm [shape: f32[16,32], index: 6, kind: output, shape index: {0}]   ;;  %s1576_s7 = inlined_call_operand.vmem [shape: f32[16,8], index: 7, kind: output, shape index: {1}]  }
   0x1   :  { %v13_v0 = vstv %s1574_s5 }
   0x2   :  { %14 = vst [vmem:[#allocation2] sm:$0x1] %v13_v0 }
   0x3   :  { %15 = vsyncpa [#allocation4], 0 }
   0x4   :  { %17 = vsyncpa [#allocation4 + $0x1], 0 }
   0x5   :  { %18 = vsyncpa [#allocation7], 0 }
   0x6   :  { %19 = vsyncpa [#allocation5], 0 }
   0x7   :  { %21 = vsyncpa [#allocation5 + $0x1], 0  ;;  %s1304_s26 = smov 0   ;;  %s1306_s27 = smov 0  }
   0x8   :  { %s1308_s28 = smov 0   ;;  %s1310_s29 = smov 0  }
   0x9 LB: > { %s1325_s5 = sadd.s32 4294967295, %s1255_s29   ;;  %s979_s30 = sadd.s32 4294967294, %s1255_s29   ;;  %s1255_s29 = sphi %s1310_s29, %s1590_s29   ;;  %s1251_s28 = sphi %s1308_s28, %s1589_s28   ;;  %s1247_s27 = sphi %s1306_s27, %s1588_s27   ;;  %s1243_s26 = sphi %s1304_s26, %s1587_s26  }
   0xa   : > { %p47_p0 = scmp.ne.s32.totalorder %s1247_s27, %s1243_s26  ;;  %p48_p1 = scmp.eq.s32.totalorder %s1325_s5, 0 }
   0xb   : > { %p181_p2 = scmp.eq.s32.totalorder %s1325_s5, 1  ;;  %p187_p3 = scmp.eq.s32.totalorder %s979_s30, 1 }
   0xc   : > { %p1334_p4 = por %p48_p1, %p47_p0  ;;  %p980_p5 = scmp.ge.s32.totalorder %s1255_s29, 1 }
   0xd   : > { %p1339_p6 = por %p187_p3, %p47_p0  ;;  %p220_p7 = scmp.lt.s32.totalorder %s1255_s29, 3 }
   0xe   : > { %s231_s12 = sshll.u32 %s1571_s2, 4  ;;  %s1257_s14 = smov [#allocation6]   ;;  %s232_s12 = int_to_ptr.hbm [resolvable:$true] %s231_s12 }
   0xf   : > { %p1347_p8 = pnand %p980_p5, %p220_p7  ;;  %s233_s15 = sshll.u32 %s1257_s14, 4  ;;  %s234_s15 = int_to_ptr.vmem [resolvable:$true] %s233_s15 }
  0x10   : > { %s1357_s16 = sadd.s32 1, %s1255_s29   ;;  %s1577_s17 = smov 128  }
  0x11   : > { %p1033_p9 = pneg %p1347_p8  ;;  %s1578_s18 = smov 8  }
  0x12   : > { %s31_s19 = ssub.s32 %s1255_s29, %s1357_s16  ;;  %s34_s20 = sadd.s32 1, %s1251_s28 }
  0x13   : > { %p1034_p10 = pnand %p1033_p9, %p48_p1  ;;  %p32_p12 = scmp.eq.s32.totalorder %s31_s19, 0 }
  0x14   : > { %p41_p13 = scmp.ne.s32.totalorder %s1251_s28, %s1247_s27  ;;  %p42_p0 = scmp.eq.s32.totalorder %s1255_s29, 0 }
  0x15   : > { %1036 = dma.hbm_to_vmem [thread:$0]  (!%p1034_p10), %s232_s12, 512, %s234_s15, [#allocation7], %s1577_s17, %s1577_s17, %s1578_s18  }
  0x16   : > { %s1369_s21 = scalar_select %p32_p12, %s1251_s28, %s34_s20  }
  0x17   : > { %p1373_p3 = por %p181_p2, %p41_p13  ;;  %p1046_p5 = scmp.lt.s32.totalorder %s1255_s29, 2 }
  0x18   : > { %s256_s23 = sand.u32 1, %s1251_s28   ;;  %s1012_s24 = sshll.u32 %s1255_s29, 6 }
  0x19   : > { %p43_p7 = por %p42_p0, %p41_p13  ;;  %s983_s25 = sshll.u32 %s256_s23, 6 }
  0x1a   : > { %s265_s11 = scalar_lea.hbm %s1569_s0, %s1012_s24  ;;  %s260_s14 = scalar_lea.vmem [#allocation3], %s983_s25 }
  0x1b   : > { %s266_s12 = sshll.u32 %s265_s11, 4  ;;  %s268_s15 = sshll.u32 %s260_s14, 4  ;;  %s267_s12 = int_to_ptr.hbm [resolvable:$true] %s266_s12  ;;  %s269_s15 = int_to_ptr.vmem [resolvable:$true] %s268_s15 }
  0x1c   : > { %p1383_p9 = pnand %p1046_p5, %p43_p7  ;;  %s257_s20 = scalar_lea.sflag [#allocation4], %s256_s23 }
  0x1d   : > { %s1155_s17 = sshra.s32 %s267_s12, 4  ;;  %s1162_s25 = scalar_lea.hbm %s1569_s0, 128  ;;  %s1156_s17 = int_to_ptr.hbm [resolvable:$true] %s1155_s17 }
  0x1e   : > { %s1157_s18 = scalar_lea.hbm %s1156_s17, 64  ;;  %p1159_p10 = pneg %p1383_p9 }
  0x1f   : > { %p1158_p2 = scmp.ne.s32.totalorder %s1156_s17, %s1157_s18  ;;  %p1163_p0 = scmp.lt.s32.totalorder %s1156_s17, %s1569_s0 }
  0x20   : > { %p1164_p5 = scmp.lt.s32.totalorder %s1162_s25, %s1157_s18 }
  0x21   : > { %p1160_p12 = pnand %p1159_p10, %p1158_p2 }
  0x22   : > { %p1165_p7 = por %p1164_p5, %p1163_p0 }
  0x23   : > { %p1161_p13 = pneg %p1160_p12 }
  0x25   : > { %p1166_p11 = pnand %p1165_p7, %p1161_p13 }
  0x27   : > { %1169 = shalt.err (!%p1166_p11)
}
  0x28   : > { %s1584_s23 = smov 8   ;;  %s1585_s14 = smov 128  }
  0x29   : > { %1040 = dma.hbm_to_vmem [thread:$0]  (!%p1383_p9), %s267_s12, 1024, %s269_s15, %s257_s20, %s1585_s14, %s1585_s14, %s1584_s23  }
  0x2a   : > { %287 = sbr.rel (%p1347_p8) target bundleno = 930 (0x3a2), region = 44  ;;  %s1403_s24 = sand.u32 (!%p1347_p8), 1, %s1247_s27  }
  0x2b   : > { %s987_s17 = sshll.u32 (!%p1347_p8), %s1403_s24, 6  ;;  %s290_s18 = scalar_lea.sflag (!%p1347_p8), [#allocation4], %s1403_s24 }
  0x2c   : > { %s1407_s30 = scalar_lea.vmem (!%p1347_p8), [#allocation3], %s987_s17 }
  0x2f   : > { %1230 = dma.done.wait (%p1334_p4), %s290_s18, 1024  }
  0x30   : > { %1232 = vsyncadd (%p1334_p4), %s290_s18, 4294966272 }
  0x31   : > { %1234 = dma.done.wait (%p48_p1), [#allocation7], 512  }
  0x32   : > { %1236 = vsyncadd (%p48_p1), [#allocation7], 4294966784  ;;  %v358_v1 = vld [vmem:[#allocation6 + $0x18] sm:$0xff]  ;;  %v357_v2 = vld [vmem:[#allocation6 + $0x10] sm:$0xff]  ;;  %vm363_vm0 = vcmask 261120   ;;  %v1260_v14 = vmov 0   ;;  %v489_v0 = vlaneseq }
  0x33   : > { %400 = vmatpush.msra.mxu0 %v358_v1  ;;  %1013 = vmatpush.msra.mxu1 %v358_v1  ;;  %v356_v3 = vld [vmem:[#allocation6 + $0x8] sm:$0xff]  ;;  %v355_v4 = vld [vmem:[#allocation6] sm:$0xff]  ;;  %v1421_v8 = vld [vmem:[%s1407_s30 + $0x30] sm:$0xff]  ;;  %p339_p1 = scmp.lt.s32.totalorder %s1325_s5, 1  ;;  %vm511_vm1 = vcmask 1041409   ;;  %vm513_vm2 = vcmask 1042434  }
  0x34   : > { %1014 = vmatpush.msra.mxu2 %v358_v1  ;;  %1015 = vmatpush.msra.mxu3 %v358_v1  ;;  %v347_v5 = vld [vmem:[%s1407_s30] sm:$0xff]  ;;  %v352_v7 = vld [vmem:[%s1407_s30 + $0x28] sm:$0xff]  ;;  %v349_v10 = vld [vmem:[%s1407_s30 + $0x10] sm:$0xff]  ;;  %vm515_vm3 = vcmask 1043459   ;;  %vm517_vm4 = vcmask 1044484   ;;  %vm519_vm5 = vcmask 1045509  }
  0x35   : > { %401 = vmatpush.msra.mxu0 %v357_v2  ;;  %1016 = vmatpush.msra.mxu1 %v357_v2  ;;  %v351_v6 = vld [vmem:[%s1407_s30 + $0x20] sm:$0xff]  ;;  %v348_v9 = vld [vmem:[%s1407_s30 + $0x8] sm:$0xff]  ;;  %v350_v11 = vld [vmem:[%s1407_s30 + $0x18] sm:$0xff]  ;;  %s1455_s19 = scalar_select %p339_p1, %s1325_s5, 1  ;;  %vm521_vm6 = vcmask 1046534   ;;  %vm523_vm7 = vcmask 1047559  }
  0x36   : > { %1017 = vmatpush.msra.mxu2 %v357_v2  ;;  %1018 = vmatpush.msra.mxu3 %v357_v2  ;;  %v1432_v12 = vld [vmem:[%s1407_s30 + $0x38] sm:$0xff]  ;;  %v1463_v2 = vand.u32 127, %v489_v0  ;;  %vm527_vm9 = vcmask 64512   ;;  %s989_s18 = sshll.u32 %s1403_s24, 3  ;;  %s1009_s30 = sshll.u32 %s1325_s5, 3 }
  0x37   : > { %402 = vmatpush.msra.mxu0 %v356_v3  ;;  %1019 = vmatpush.msra.mxu1 %v356_v3  ;;  %v1088_v13 = vld [vmem:[%s1572_s3] ss:$0 sm:$0xff]  ;;  %s990_s20 = sshll.u32 %s1455_s19, 3  ;;  %s855_s12 = scalar_lea.hbm %s1575_s6, %s1009_s30 }
  0x38   : > { %1020 = vmatpush.msra.mxu2 %v356_v3  ;;  %1021 = vmatpush.msra.mxu3 %v356_v3  ;;  %v1089_v19 = vld [vmem:[%s1573_s4] ss:$0 sm:$0xff]  ;;  %s342_s11 = scalar_lea.vmem %s1570_s1, %s990_s20  ;;  %s346_s17 = scalar_lea.vmem %s1576_s7, %s990_s20 }
  0x39   : > { %403 = vmatpush.msra.mxu0 %v355_v4  ;;  %1022 = vmatpush.msra.mxu1 %v355_v4  ;;  %v1090_v56 = vld [vmem:[#allocation2] ss:$0 sm:$0xff]  ;;  %s331_s15 = scalar_lea.vmem [#allocation8], %s989_s18  ;;  %s859_s20 = sshll.u32 %s855_s12, 4  ;;  %s860_s20 = int_to_ptr.hbm [resolvable:$true] %s859_s20 }
  0x3a   : > { %992 = vmatmul.msk.f32.vlgmr.msra.gmra.mxu0 %vm363_vm0, %v347_v5  ;;  %996 = vmatmul.msk.f32.vlgmr.msra.gmra.mxu1 %vm363_vm0, %v351_v6  ;;  %v488_v57 = vld [vmem:[%s342_s11] sm:$0xff]  ;;  %s857_s19 = sshll.u32 %s331_s15, 4  ;;  %s841_s5 = scalar_lea.sflag [#allocation5], %s1403_s24  ;;  %s858_s19 = int_to_ptr.vmem [resolvable:$true] %s857_s19 }
  0x3b   : > { %1023 = vmatpush.msra.mxu2 %v355_v4  ;;  %1024 = vmatpush.msra.mxu3 %v355_v4  ;;  %s1199_s25 = sshra.s32 %s860_s20, 4  ;;  %s1205_s14 = scalar_lea.hbm %s1575_s6, 16  ;;  %s1200_s25 = int_to_ptr.hbm [resolvable:$true] %s1199_s25 }
  0x3c   : > { %997 = vmatmul.msk.f32.vlgmr.msra.gmra.mxu2 %vm363_vm0, %v352_v7  ;;  %998 = vmatmul.msk.f32.vlgmr.msra.gmra.mxu3 %vm363_vm0, %v1421_v8  ;;  %s1201_s10 = scalar_lea.hbm %s1200_s25, 8  ;;  %p1206_p9 = scmp.lt.s32.totalorder %s1200_s25, %s1575_s6 }
  0x3d   : > { %701 = vmatpush.msrb.mxu3 %v349_v10  ;;  %679 = vmatpush.msrb.mxu2 %v348_v9  ;;  %p1202_p4 = scmp.ne.s32.totalorder %s1200_s25, %s1201_s10  ;;  %p1207_p2 = scmp.lt.s32.totalorder %s1205_s14, %s1201_s10 }
  0x3e   : > { %657 = vmatpush.msrb.mxu1 %v347_v5  ;;  %1085 = vset.pattern.permute.xlu1 %v1260_v14 }
  0x3f   : > { %745 = vmatpush.msra.mxu2 %v351_v6  ;;  %767 = vmatpush.msra.mxu3 %v352_v7  ;;  %p1203_p8 = pnand %p1202_p4, %p1373_p3  ;;  %p1208_p10 = por %p1207_p2, %p1206_p9 }
  0x40   : > { %723 = vmatpush.msra.mxu1 %v350_v11  ;;  %1086 = vset.pattern.permute.xlu2 %v1260_v14 }
  0x41   : > { %1087 = vset.pattern.permute.xlu0 %v1260_v14  ;;  %p1204_p11 = pneg %p1203_p8 }
  0x42   : > { %993 = vmatmul.msk.f32.gmra.mxu0 %vm363_vm0, %v348_v9 }
  0x43   : > { %p1209_p12 = pnand %p1208_p10, %p1204_p11 }
  0x44   : > { %999 = vmatmul.msk.f32.gmra.mxu3 %vm363_vm0, %v1432_v12 }
  0x4a   : > { %994 = vmatmul.msk.f32.gmra.mxu0 %vm363_vm0, %v349_v10 }
  0x52   : > { %995 = vmatmul.msk.f32.gmra.mxu0 %vm363_vm0, %v350_v11 }
  0xb7   : > { %v405_v15 = vpop.f32.mrf.mxu0  ;;  %v417_v16 = vpop.f32.mrf.mxu1 }
  0xb8   : > { %v406_v17 = vadd.f32 %v1088_v13, %v405_v15  ;;  %v418_v18 = vadd.f32 %v1088_v13, %v417_v16 }
  0xba   : > { %1091 = vtanh.f32 %v406_v17 }
  0xbb   : > { %1093 = vtanh.f32 %v418_v18 }
  0xbf   : > { %v408_v20 = vpop.f32.mrf.mxu0  ;;  %v420_v21 = vpop.f32.mrf.mxu2 }
  0xc0   : > { %v1092_v22 = vpop.eup %1091  ;;  %v409_v23 = vadd.f32 %v1088_v13, %v408_v20  ;;  %v421_v24 = vadd.f32 %v1088_v13, %v420_v21  ;;  %v423_v25 = vpop.f32.mrf.mxu3 }
  0xc1   : > { %v1094_v26 = vpop.eup %1093  ;;  %v441_v27 = vmul.f32 %v1092_v22, %v1089_v19  ;;  %v424_v28 = vadd.f32 %v1088_v13, %v423_v25 }
  0xc2   : > { %1095 = vtanh.f32 %v409_v23  ;;  %v445_v29 = vmul.f32 %v1094_v26, %v1089_v19 }
  0xc3   : > { %v449_v30 = vsel %vm363_vm0, %v441_v27, 0.0  ;;  %1097 = vtanh.f32 %v421_v24 }
  0xc4   : > { %450 = vadd.xlane.f32.xlu0 %v449_v30  ;;  %1099 = vtanh.f32 %v424_v28  ;;  %v461_v31 = vsel %vm363_vm0, %v445_v29, 0.0 }
  0xc5   : > { %462 = vadd.xlane.f32.xlu2 %v461_v31 }
  0xc7   : > { %v411_v32 = vpop.f32.mrf.mxu0 }
  0xc8   : > { %v1096_v33 = vpop.eup %1095  ;;  %v412_v34 = vadd.f32 %v1088_v13, %v411_v32  ;;  %v426_v35 = vpop.f32.mrf.mxu3 }
  0xc9   : > { %v1098_v36 = vpop.eup %1097  ;;  %v442_v37 = vmul.f32 %v1096_v33, %v1089_v19  ;;  %v427_v38 = vadd.f32 %v1088_v13, %v426_v35 }
  0xca   : > { %v1100_v39 = vpop.eup %1099  ;;  %1101 = vtanh.f32 %v412_v34  ;;  %v446_v43 = vmul.f32 %v1098_v36, %v1089_v19 }
  0xcb   : > { %v452_v40 = vsel %vm363_vm0, %v442_v37, 0.0  ;;  %v447_v41 = vmul.f32 %v1100_v39, %v1089_v19  ;;  %1103 = vtanh.f32 %v427_v38 }
  0xcc   : > { %453 = vadd.xlane.f32.xlu0 %v452_v40  ;;  %v464_v48 = vsel %vm363_vm0, %v446_v43, 0.0 }
  0xcd   : > { %v467_v42 = vsel %vm363_vm0, %v447_v41, 0.0 }
  0xce   : > { %468 = vadd.xlane.f32.xlu2 %v467_v42 }
  0xcf   : > { %v414_v44 = vpop.f32.mrf.mxu0 }
  0xd0   : > { %v1102_v45 = vpop.eup %1101  ;;  %v415_v46 = vadd.f32 %v1088_v13, %v414_v44 }
  0xd1   : > { %v443_v47 = vmul.f32 %v1102_v45, %v1089_v19  ;;  %v1104_v49 = vpop.eup %1103 }
  0xd2   : > { %1105 = vtanh.f32 %v415_v46  ;;  %v448_v51 = vmul.f32 %v1104_v49, %v1089_v19 }
  0xd3   : > { %v455_v50 = vsel %vm363_vm0, %v443_v47, 0.0 }
  0xd4   : > { %456 = vadd.xlane.f32.xlu1 %v455_v50  ;;  %465 = vadd.xlane.f32.xlu0 %v464_v48  ;;  %v470_v54 = vsel %vm363_vm0, %v448_v51, 0.0 }
  0xd8   : > { %v1106_v52 = vpop.eup %1105 }
  0xd9   : > { %v444_v53 = vmul.f32 %v1106_v52, %v1089_v19 }
  0xdb   : > { %v458_v55 = vsel %vm363_vm0, %v444_v53, 0.0 }
  0xdc   : > { %459 = vadd.xlane.f32.xlu2 %v458_v55  ;;  %471 = vadd.xlane.f32.xlu0 %v470_v54 }
  0xed   : > { %477 = vperm.xlu1 %1085, %v1090_v56  }
  0xf4   : > { %492 = vperm.xlu2 %1086, %v488_v57  }
 0x137   : > { %v451_v58 = vpop.xlane.xlu0 %450 }
 0x138   : > { %v463_v59 = vpop.xlane.xlu2 %462 }
 0x13f   : > { %v454_v60 = vpop.xlane.xlu0 %453 }
 0x141   : > { %v469_v61 = vpop.xlane.xlu2 %468 }
 0x147   : > { %v457_v62 = vpop.xlane.xlu1 %456  ;;  %v466_v63 = vpop.xlane.xlu0 %465 }
 0x14f   : > { %v460_v1 = vpop.xlane.xlu2 %459  ;;  %v472_v7 = vpop.xlane.xlu0 %471 }
 0x157   : > { %v1472_v20 = vpop.permute.xlu2 %492 }
 0x158   : > { %vm494_vm8 = vcmp.lt.s32.totalorder %v1463_v2, %v1472_v20 }
 0x15f   : > { %v478_v3 = vpop.permute.xlu1 %477 }
 0x160   : > { %v480_v4 = vadd.f32 %v478_v3, %v451_v58  ;;  %v481_v5 = vadd.f32 %v478_v3, %v454_v60  ;;  %v482_v6 = vadd.f32 %v478_v3, %v457_v62  ;;  %v483_v9 = vadd.f32 %v478_v3, %v460_v1 }
 0x161   : > { %v484_v10 = vadd.f32 %v478_v3, %v463_v59  ;;  %v485_v11 = vadd.f32 %v478_v3, %v466_v63  ;;  %v1468_v16 = vadd.f32 %v478_v3, %v469_v61  ;;  %v487_v17 = vadd.f32 %v478_v3, %v472_v7 }
 0x162   : > { %v503_v13 = vperm.slane %v480_v4, %v1463_v2  ;;  %v504_v14 = vperm.slane %v481_v5, %v1463_v2  ;;  %v505_v15 = vperm.slane %v482_v6, %v1463_v2  ;;  %v506_v18 = vperm.slane %v483_v9, %v1463_v2 }
 0x163   : > { %v507_v21 = vperm.slane %v484_v10, %v1463_v2  ;;  %v508_v23 = vperm.slane %v485_v11, %v1463_v2  ;;  %v509_v25 = vperm.slane %v1468_v16, %v1463_v2  ;;  %v510_v27 = vperm.slane %v487_v17, %v1463_v2 }
 0x164   : > { %v512_v19 = vsel %vm511_vm1, %v504_v14, %v503_v13 }
 0x165   : > { %v514_v22 = vsel %vm513_vm2, %v505_v15, %v512_v19 }
 0x166   : > { %v516_v24 = vsel %vm515_vm3, %v506_v18, %v514_v22 }
 0x167   : > { %v518_v26 = vsel %vm517_vm4, %v507_v21, %v516_v24 }
 0x168   : > { %v520_v28 = vsel %vm519_vm5, %v508_v23, %v518_v26 }
 0x169   : > { %v522_v29 = vsel %vm521_vm6, %v509_v25, %v520_v28 }
 0x16a   : > { %v524_v30 = vsel %vm523_vm7, %v510_v27, %v522_v29 }
 0x16b   : > { %v526_v31 = vsel %vm494_vm8, %v524_v30, -1e+30 }
 0x16c   : > { %v528_v32 = vsel %vm527_vm9, %v526_v31, -inf }
 0x16d   : > { %529 = vmax.xlane.f32.xlu0 %v528_v32 }
 0x1e0   : > { %v530_v33 = vpop.xlane.xlu0 %529 }
 0x1e1   : > { %v535_v34 = vperm.slane %v530_v33, 3  ;;  %v533_v35 = vperm.slane %v530_v33, 1  ;;  %v532_v36 = vperm.slane %v530_v33, 0  ;;  %v537_v40 = vperm.slane %v530_v33, 5 }
 0x1e2   : > { %v534_v41 = vperm.slane %v530_v33, 2  ;;  %v539_v48 = vperm.slane %v530_v33, 7  ;;  %v536_v51 = vperm.slane %v530_v33, 4  ;;  %v538_v59 = vperm.slane %v530_v33, 6 }
 0x1e3   : > { %v551_v37 = vsub.f32 %v483_v9, %v535_v34  ;;  %v549_v38 = vsub.f32 %v481_v5, %v533_v35  ;;  %v548_v39 = vsub.f32 %v480_v4, %v532_v36  ;;  %v553_v45 = vsub.f32 %v485_v11, %v537_v40 }
 0x1e4   : > { %v550_v46 = vsub.f32 %v482_v6, %v534_v41  ;;  %v555_v54 = vsub.f32 %v487_v17, %v539_v48  ;;  %v552_v55 = vsub.f32 %v484_v10, %v536_v51  ;;  %v554_v61 = vsub.f32 %v1468_v16, %v538_v59 }
 0x1e5   : > { %v562_v42 = vmul.f32 1.442695, %v551_v37  ;;  %v558_v43 = vmul.f32 1.442695, %v549_v38  ;;  %v556_v44 = vmul.f32 1.442695, %v548_v39 }
 0x1e6   : > { %v566_v47 = vmul.f32 1.442695, %v553_v45  ;;  %v560_v50 = vmul.f32 1.442695, %v550_v46  ;;  %v570_v56 = vmul.f32 1.442695, %v555_v54 }
 0x1e7   : > { %1107 = vpow2.f32 %v562_v42  ;;  %v564_v58 = vmul.f32 1.442695, %v552_v55  ;;  %v568_v63 = vmul.f32 1.442695, %v554_v61 }
 0x1e8   : > { %1109 = vpow2.f32 %v558_v43 }
 0x1e9   : > { %1111 = vpow2.f32 %v556_v44 }
 0x1ea   : > { %1113 = vpow2.f32 %v566_v47 }
 0x1eb   : > { %1115 = vpow2.f32 %v560_v50 }
 0x1ec   : > { %1117 = vpow2.f32 %v570_v56 }
 0x1ed   : > { %v1108_v49 = vpop.eup %1107  ;;  %1119 = vpow2.f32 %v564_v58 }
 0x1ee   : > { %v1110_v52 = vpop.eup %1109  ;;  %590 = vperm.xlu2 %1086, %v1108_v49   ;;  %1121 = vpow2.f32 %v568_v63 }
 0x1ef   : > { %v1112_v53 = vpop.eup %1111  ;;  %584 = vperm.xlu0 %1087, %v1110_v52  }
 0x1f0   : > { %581 = vperm.xlu1 %1085, %v1112_v53   ;;  %v1114_v57 = vpop.eup %1113 }
 0x1f1   : > { %v1116_v60 = vpop.eup %1115 }
 0x1f2   : > { %v1118_v62 = vpop.eup %1117 }
 0x1f3   : > { %v1120_v0 = vpop.eup %1119 }
 0x1f4   : > { %v1122_v1 = vpop.eup %1121 }
 0x1f6   : > { %596 = vperm.xlu2 %1086, %v1114_v57  }
 0x1f8   : > { %587 = vperm.xlu1 %1085, %v1116_v60  }
 0x1fe   : > { %602 = vperm.xlu2 %1086, %v1118_v62  }
 0x200   : > { %593 = vperm.xlu1 %1085, %v1120_v0  }
 0x208   : > { %599 = vperm.xlu1 %1085, %v1122_v1  }
 0x248   : > { %v591_v4 = vpop.permute.xlu2 %590 }
 0x249   : > { %v607_v17 = vperm.slane %v591_v4, %v1463_v2 }
 0x250   : > { %v597_v7 = vpop.permute.xlu2 %596 }
 0x251   : > { %v609_v22 = vperm.slane %v597_v7, %v1463_v2 }
 0x258   : > { %v603_v19 = vpop.permute.xlu2 %602 }
 0x259   : > { %v611_v25 = vperm.slane %v603_v19, %v1463_v2 }
 0x261   : > { %v585_v6 = vpop.permute.xlu0 %584 }
 0x262   : > { %v582_v3 = vpop.permute.xlu1 %581  ;;  %v605_v9 = vperm.slane %v585_v6, %v1463_v2 }
 0x263   : > { %v604_v10 = vperm.slane %v582_v3, %v1463_v2 }
 0x265   : > { %v612_v14 = vsel %vm511_vm1, %v605_v9, %v604_v10 }
 0x26a   : > { %v588_v5 = vpop.permute.xlu1 %587 }
 0x26b   : > { %v606_v11 = vperm.slane %v588_v5, %v1463_v2 }
 0x26d   : > { %v613_v15 = vsel %vm513_vm2, %v606_v11, %v612_v14 }
 0x26e   : > { %v614_v18 = vsel %vm515_vm3, %v607_v17, %v613_v15 }
 0x272   : > { %v594_v13 = vpop.permute.xlu1 %593 }
 0x273   : > { %v608_v16 = vperm.slane %v594_v13, %v1463_v2 }
 0x275   : > { %v615_v21 = vsel %vm517_vm4, %v608_v16, %v614_v18 }
 0x276   : > { %v616_v26 = vsel %vm519_vm5, %v609_v22, %v615_v21 }
 0x27a   : > { %v600_v23 = vpop.permute.xlu1 %599 }
 0x27b   : > { %v610_v24 = vperm.slane %v600_v23, %v1463_v2 }
 0x27d   : > { %v617_v27 = vsel %vm521_vm6, %v610_v24, %v616_v26 }
 0x27e   : > { %v618_v28 = vsel %vm523_vm7, %v611_v25, %v617_v27 }
 0x27f   : > { %v620_v29 = vsel %vm494_vm8, %v618_v28, 0.0 }
 0x280   : > { %v621_v30 = vsel %vm527_vm9, %v620_v29, 0.0 }
 0x281   : > { %622 = vadd.xlane.f32.xlu1 %v621_v30 }
 0x2f4   : > { %v623_v31 = vpop.xlane.xlu1 %622 }
 0x2f5   : > { %vm624_vm10 = vcmp.gt.f32.partialorder %v623_v31, 0.0 }
 0x2f6   : > { %v625_v32 = vsel %vm624_vm10, %v623_v31, 1.0 }
 0x2f7   : > { %1123 = vrcp.f32 %v625_v32 }
 0x2fd   : > { %v1124_v33 = vpop.eup %1123 }
 0x2fe   : > { %v627_v34 = vmul.f32 %v1124_v33, %v625_v32 }
 0x300   : > { %v628_v35 = vsub.f32 2.0, %v627_v34 }
 0x302   : > { %v629_v36 = vmul.f32 %v1124_v33, %v628_v35 }
 0x304   : > { %v630_v37 = vmul.f32 %v629_v36, %v620_v29 }
 0x306   : > { %631 = vst.msk [vmem:[%s346_s17] sm:$0xff] %vm527_vm9, %v630_v37  ;;  %1000 = vmatmul.msk.f32.vlgmr.msrb.gmra.mxu1 %vm527_vm9, %v630_v37  ;;  %v633_v2 = vrot.slane %v630_v37, 1  ;;  %v634_v20 = vrot.slane %v630_v37, 2  ;;  %v635_v38 = vrot.slane %v630_v37, 3  ;;  %v636_v39 = vrot.slane %v630_v37, 4 }
 0x307   : > { %789 = vmatpush.msrb.mxu1 %v1421_v8  ;;  %v637_v40 = vrot.slane %v630_v37, 5  ;;  %v638_v41 = vrot.slane %v630_v37, 6  ;;  %v639_v8 = vrot.slane %v630_v37, 7 }
 0x308   : > { %1001 = vmatmul.msk.f32.vlgmr.msrb.gmra.mxu2 %vm527_vm9, %v633_v2  ;;  %1002 = vmatmul.msk.f32.vlgmr.msrb.gmra.mxu3 %vm527_vm9, %v634_v20 }
 0x309   : > { %811 = vmatpush.msrb.mxu2 %v1432_v12 }
 0x30e   : > { %1003 = vmatmul.msk.f32.vlgmr.msra.gmra.mxu1 %vm527_vm9, %v635_v38 }
 0x310   : > { %1004 = vmatmul.msk.f32.vlgmr.msra.gmra.mxu2 %vm527_vm9, %v636_v39  ;;  %1005 = vmatmul.msk.f32.vlgmr.msra.gmra.mxu3 %vm527_vm9, %v637_v40 }
 0x316   : > { %1006 = vmatmul.msk.f32.vlgmr.msrb.gmra.mxu1 %vm527_vm9, %v638_v41 }
 0x318   : > { %1007 = vmatmul.msk.f32.vlgmr.msrb.gmra.mxu2 %vm527_vm9, %v639_v8 }
 0x383   : > { %v659_v42 = vpop.f32.mrf.mxu1 }
 0x38b   : > { %v681_v43 = vpop.f32.mrf.mxu2  ;;  %v703_v12 = vpop.f32.mrf.mxu3 }
 0x38c   : > { %v824_v44 = vrot.slane %v681_v43, 7  ;;  %v725_v45 = vpop.f32.mrf.mxu1  ;;  %v826_v46 = vrot.slane %v703_v12, 6 }
 0x38d   : > { %v828_v51 = vrot.slane %v725_v45, 5 }
 0x38e   : > { %v825_v47 = vsel %vm511_vm1, %v824_v44, %v659_v42 }
 0x38f   : > { %v827_v48 = vsel %vm513_vm2, %v826_v46, %v825_v47 }
 0x390   : > { %v829_v53 = vsel %vm515_vm3, %v828_v51, %v827_v48 }
 0x393   : > { %v747_v49 = vpop.f32.mrf.mxu2  ;;  %v769_v50 = vpop.f32.mrf.mxu3 }
 0x394   : > { %v830_v52 = vrot.slane %v747_v49, 4  ;;  %v832_v54 = vrot.slane %v769_v50, 3  ;;  %v791_v56 = vpop.f32.mrf.mxu1 }
 0x395   : > { %v834_v58 = vrot.slane %v791_v56, 2 }
 0x396   : > { %v831_v55 = vsel %vm517_vm4, %v830_v52, %v829_v53 }
 0x397   : > { %v833_v57 = vsel %vm519_vm5, %v832_v54, %v831_v55 }
 0x398   : > { %v835_v61 = vsel %vm521_vm6, %v834_v58, %v833_v57 }
 0x39b   : > { %v813_v59 = vpop.f32.mrf.mxu2 }
 0x39c   : > { %v836_v60 = vrot.slane %v813_v59, 1 }
 0x39e   : > { %v837_v62 = vsel %vm523_vm7, %v836_v60, %v835_v61 }
 0x39f   : > { %839 = vst.msk [vmem:[%s331_s15] sm:$0xff] %vm363_vm0, %v837_v62 }
 0x3a0   : > { %1212 = shalt.err (!%p1209_p12)
}
 0x3a1   : > { %1031 = dma.vmem_to_hbm [thread:$0]  (%p1373_p3), %s858_s19, 128, %s860_s20, %s841_s5  }
 0x3a2 PF: > { %s874_s24 = sand.u32 1, %s1243_s26   ;;  %p1586_p13 = scmp.ge.s32.totalorder %s1255_s29, 2 }
 0x3a3   : > { %s875_s30 = scalar_lea.sflag [#allocation5], %s874_s24 }
 0x3a4   : > { %p1042_p0 = pnand %p1586_p13, %p1339_p6 }
 0x3a6   : > { %p1043_p5 = pneg %p1042_p0 }
 0x3a8   : > { %1238 = dma.done.wait (%p1043_p5), %s875_s30, 128  }
 0x3a9   : > { %1240 = vsyncadd (%p1043_p5), %s875_s30, 4294967168  ;;  %p24_p7 = scmp.ge.s32.totalorder %s1357_s16, 4   ;;  %s1587_s26 = smov %s1247_s27 }
 0x3aa   : > { %s1588_s27 = smov %s1251_s28  ;;  %s1589_s28 = smov %s1369_s21 }
 0x3ab   : > { %s1590_s29 = smov %s1357_s16  ;;  %26 = sbr.rel (!%p24_p7) target bundleno = 9 (0x9), region = 108 }
 0x3b0   :  { %888 = vsyncpa [#allocation4], 1 }
 0x3b1   :  { %890 = vsyncpa [#allocation4 + $0x1], 1 }
 0x3b2   :  { %891 = vsyncpa [#allocation7], 1 }
 0x3b3   :  { %892 = vsyncpa [#allocation5], 1 }
 0x3b4   :  { %894 = vsyncpa [#allocation5 + $0x1], 1 }

</bundles_post_ra>
